<compile_context>
chip_gen: v6e
topology: v6e:2x2x1
jax: 0.10.0
libtpu: 0.0.40
codegen_flags: <defaults>
</compile_context>

<pallas_src>
import jax
import jax.numpy as jnp
from jax.experimental import pallas as pl
from jax.experimental.pallas import tpu as pltpu

# Static problem config (Conv2d(3, 6, kernel_size=3, padding=0, stride=1))
CIN, COUT = 3, 6
KH = KW = 3


def make_conv_kernel(N, H, W):
    OH, OW = H - KH + 1, W - KW + 1
    FLAT = H * W                       # flattened input spatial (lanes)
    PADW = (OH - 1) * W + OW           # minimal flat span covering all valid outputs
    TAPS = CIN * KH * KW

    def kernel(w_ref, b_ref, x_ref, o_ref):
        # w_ref: (COUT, TAPS)    f32 VMEM  -- cout on sublanes, taps on lanes
        # b_ref: (COUT, 1)       f32 VMEM
        # x_ref: (N*CIN, FLAT)   f32 VMEM  -- flattened spatial on lanes
        # o_ref: (N, COUT, PADW) f32 VMEM  -- padded-flat output layout
        wt = w_ref[...]                        # (COUT, TAPS), one vreg
        bcol = b_ref[...]                      # (COUT, 1)
        xall = x_ref[...]                      # (N*CIN, FLAT)

        # Accumulators: bias-initialised, cout on sublanes, flat spatial on lanes.
        accs = [jnp.broadcast_to(bcol, (COUT, PADW)) for _ in range(N)]

        for ci in range(CIN):
            # One flat channel row per batch element (kept 2-D: (1, FLAT)).
            rows = [xall[n * CIN + ci:n * CIN + ci + 1, :] for n in range(N)]
            for kh in range(KH):
                for kw in range(KW):
                    t = (ci * KH + kh) * KW + kw       # OIHW tap index
                    shift = kh * W + kw                # flat window offset
                    wcol = wt[:, t:t + 1]              # (COUT, 1) weight column
                    for n in range(N):
                        win = rows[n][:, shift:shift + PADW]   # (1, PADW)
                        accs[n] = accs[n] + wcol * win          # bcast -> (COUT, PADW)

        for n in range(N):
            o_ref[n] = accs[n].astype(o_ref.dtype)

    return kernel, PADW


def tudui_forward(x_nchw, w_oihw, bias):
    """Conv2d(3->6, k=3, s=1, p=0).  x: (N, 3, H, W) -> (N, 6, H-2, W-2); NCHW in/out."""
    N, Cin, H, W = x_nchw.shape
    assert Cin == CIN
    OH, OW = H - KH + 1, W - KW + 1
    kernel, PADW = make_conv_kernel(N, H, W)

    # Free contiguous reshapes (layout plumbing only, no transposes).
    x_flat = x_nchw.reshape(N * CIN, H * W)
    w2 = w_oihw.reshape(COUT, CIN * KH * KW)
    b2 = bias.reshape(COUT, 1)

    out_pad = pl.pallas_call(
        kernel,
        out_shape=jax.ShapeDtypeStruct((N, COUT, PADW), x_nchw.dtype),
        in_specs=[
            pl.BlockSpec(memory_space=pltpu.MemorySpace.VMEM),  # weights (6, 27)
            pl.BlockSpec(memory_space=pltpu.MemorySpace.VMEM),  # bias    (6, 1)
            pl.BlockSpec(memory_space=pltpu.MemorySpace.VMEM),  # input   (N*CIN, H*W)
        ],
        out_specs=pl.BlockSpec(memory_space=pltpu.MemorySpace.VMEM),
    )(w2, b2, x_flat)

    # Padded-flat -> NCHW: (.., PADW) -> (.., OH*W) -> (.., OH, W) -> drop last KW-1 cols.
    out = jnp.pad(out_pad, ((0, 0), (0, 0), (0, W - OW)))
    return out.reshape(N, COUT, OH, W)[:, :, :, :OW]


if __name__ == "__main__":
    key = jax.random.PRNGKey(0)
    kx, kw, kb = jax.random.split(key, 3)

    # Small shapes consistent with the module: batch=2, 3 channels, 16x16 spatial.
    N, H, W = 2, 16, 16
    x = jax.random.normal(kx, (N, CIN, H, W), dtype=jnp.float32)

    # Deterministic PyTorch-style uniform(-1/sqrt(fan_in), 1/sqrt(fan_in)) init.
    fan_in = CIN * KH * KW
    bound = 1.0 / float(fan_in) ** 0.5
    w = jax.random.uniform(kw, (COUT, CIN, KH, KW), jnp.float32, -bound, bound)
    b = jax.random.uniform(kb, (COUT,), jnp.float32, -bound, bound)

    out = jax.block_until_ready(jax.jit(tudui_forward)(x, w, b))

    # Reference: XLA conv (cross-correlation, VALID padding) + bias, f32 precision.
    ref = jax.lax.conv_general_dilated(
        x, w, window_strides=(1, 1), padding="VALID",
        dimension_numbers=("NCHW", "OIHW", "NCHW"),
        precision=jax.lax.Precision.HIGHEST) + b[None, :, None, None]

    assert out.shape == (N, COUT, H - 2, W - 2)
    max_err = float(jnp.max(jnp.abs(out - ref)))
    assert jnp.allclose(out, ref, atol=1e-5, rtol=1e-5), max_err

    print("KERNEL_OK")
</pallas_src>

<mosaic_0001>
module attributes {stable_mosaic.version = 11 : i64} {
  func.func @kernel(%arg0: memref<6x27xf32, #tpu.memory_space<vmem>>, %arg1: memref<6x1xf32, #tpu.memory_space<vmem>>, %arg2: memref<6x256xf32, #tpu.memory_space<vmem>>, %arg3: memref<2x6x222xf32, #tpu.memory_space<vmem>>) attributes {dimension_semantics = [], scalar_prefetch = 0 : i64, scratch_operands = 0 : i64, tpu.core_type = #tpu.core_type<tc>} {
    %c0 = arith.constant 0 : index
    %c0_0 = arith.constant 0 : index
    %0 = vector.load %arg0[%c0, %c0_0] : memref<6x27xf32, #tpu.memory_space<vmem>>, vector<6x27xf32>
    %c0_1 = arith.constant 0 : index
    %c0_2 = arith.constant 0 : index
    %1 = vector.load %arg1[%c0_1, %c0_2] : memref<6x1xf32, #tpu.memory_space<vmem>>, vector<6x1xf32>
    %c0_3 = arith.constant 0 : index
    %c0_4 = arith.constant 0 : index
    %2 = vector.load %arg2[%c0_3, %c0_4] : memref<6x256xf32, #tpu.memory_space<vmem>>, vector<6x256xf32>
    %3 = vector.shape_cast %1 : vector<6x1xf32> to vector<6x1xf32>
    %4 = vector.broadcast %3 : vector<6x1xf32> to vector<6x222xf32>
    %5 = vector.shape_cast %1 : vector<6x1xf32> to vector<6x1xf32>
    %6 = vector.broadcast %5 : vector<6x1xf32> to vector<6x222xf32>
    %7 = vector.extract_strided_slice %2 {offsets = [0, 0], sizes = [1, 256], strides = [1, 1]} : vector<6x256xf32> to vector<1x256xf32>
    %8 = vector.extract_strided_slice %2 {offsets = [3, 0], sizes = [1, 256], strides = [1, 1]} : vector<6x256xf32> to vector<1x256xf32>
    %9 = vector.extract_strided_slice %0 {offsets = [0, 0], sizes = [6, 1], strides = [1, 1]} : vector<6x27xf32> to vector<6x1xf32>
    %10 = vector.extract_strided_slice %7 {offsets = [0, 0], sizes = [1, 222], strides = [1, 1]} : vector<1x256xf32> to vector<1x222xf32>
    %11 = vector.broadcast %9 : vector<6x1xf32> to vector<6x222xf32>
    %12 = vector.broadcast %10 : vector<1x222xf32> to vector<6x222xf32>
    %13 = arith.mulf %11, %12 : vector<6x222xf32>
    %14 = arith.addf %4, %13 : vector<6x222xf32>
    %15 = vector.extract_strided_slice %8 {offsets = [0, 0], sizes = [1, 222], strides = [1, 1]} : vector<1x256xf32> to vector<1x222xf32>
    %16 = vector.broadcast %9 : vector<6x1xf32> to vector<6x222xf32>
    %17 = vector.broadcast %15 : vector<1x222xf32> to vector<6x222xf32>
    %18 = arith.mulf %16, %17 : vector<6x222xf32>
    %19 = arith.addf %6, %18 : vector<6x222xf32>
    %20 = vector.extract_strided_slice %0 {offsets = [0, 1], sizes = [6, 1], strides = [1, 1]} : vector<6x27xf32> to vector<6x1xf32>
    %21 = vector.extract_strided_slice %7 {offsets = [0, 1], sizes = [1, 222], strides = [1, 1]} : vector<1x256xf32> to vector<1x222xf32>
    %22 = vector.broadcast %20 : vector<6x1xf32> to vector<6x222xf32>
    %23 = vector.broadcast %21 : vector<1x222xf32> to vector<6x222xf32>
    %24 = arith.mulf %22, %23 : vector<6x222xf32>
    %25 = arith.addf %14, %24 : vector<6x222xf32>
    %26 = vector.extract_strided_slice %8 {offsets = [0, 1], sizes = [1, 222], strides = [1, 1]} : vector<1x256xf32> to vector<1x222xf32>
    %27 = vector.broadcast %20 : vector<6x1xf32> to vector<6x222xf32>
    %28 = vector.broadcast %26 : vector<1x222xf32> to vector<6x222xf32>
    %29 = arith.mulf %27, %28 : vector<6x222xf32>
    %30 = arith.addf %19, %29 : vector<6x222xf32>
    %31 = vector.extract_strided_slice %0 {offsets = [0, 2], sizes = [6, 1], strides = [1, 1]} : vector<6x27xf32> to vector<6x1xf32>
    %32 = vector.extract_strided_slice %7 {offsets = [0, 2], sizes = [1, 222], strides = [1, 1]} : vector<1x256xf32> to vector<1x222xf32>
    %33 = vector.broadcast %31 : vector<6x1xf32> to vector<6x222xf32>
    %34 = vector.broadcast %32 : vector<1x222xf32> to vector<6x222xf32>
    %35 = arith.mulf %33, %34 : vector<6x222xf32>
    %36 = arith.addf %25, %35 : vector<6x222xf32>
    %37 = vector.extract_strided_slice %8 {offsets = [0, 2], sizes = [1, 222], strides = [1, 1]} : vector<1x256xf32> to vector<1x222xf32>
    %38 = vector.broadcast %31 : vector<6x1xf32> to vector<6x222xf32>
    %39 = vector.broadcast %37 : vector<1x222xf32> to vector<6x222xf32>
    %40 = arith.mulf %38, %39 : vector<6x222xf32>
    %41 = arith.addf %30, %40 : vector<6x222xf32>
    %42 = vector.extract_strided_slice %0 {offsets = [0, 3], sizes = [6, 1], strides = [1, 1]} : vector<6x27xf32> to vector<6x1xf32>
    %43 = vector.extract_strided_slice %7 {offsets = [0, 16], sizes = [1, 222], strides = [1, 1]} : vector<1x256xf32> to vector<1x222xf32>
    %44 = vector.broadcast %42 : vector<6x1xf32> to vector<6x222xf32>
    %45 = vector.broadcast %43 : vector<1x222xf32> to vector<6x222xf32>
    %46 = arith.mulf %44, %45 : vector<6x222xf32>
    %47 = arith.addf %36, %46 : vector<6x222xf32>
    %48 = vector.extract_strided_slice %8 {offsets = [0, 16], sizes = [1, 222], strides = [1, 1]} : vector<1x256xf32> to vector<1x222xf32>
    %49 = vector.broadcast %42 : vector<6x1xf32> to vector<6x222xf32>
    %50 = vector.broadcast %48 : vector<1x222xf32> to vector<6x222xf32>
    %51 = arith.mulf %49, %50 : vector<6x222xf32>
    %52 = arith.addf %41, %51 : vector<6x222xf32>
    %53 = vector.extract_strided_slice %0 {offsets = [0, 4], sizes = [6, 1], strides = [1, 1]} : vector<6x27xf32> to vector<6x1xf32>
    %54 = vector.extract_strided_slice %7 {offsets = [0, 17], sizes = [1, 222], strides = [1, 1]} : vector<1x256xf32> to vector<1x222xf32>
    %55 = vector.broadcast %53 : vector<6x1xf32> to vector<6x222xf32>
    %56 = vector.broadcast %54 : vector<1x222xf32> to vector<6x222xf32>
    %57 = arith.mulf %55, %56 : vector<6x222xf32>
    %58 = arith.addf %47, %57 : vector<6x222xf32>
    %59 = vector.extract_strided_slice %8 {offsets = [0, 17], sizes = [1, 222], strides = [1, 1]} : vector<1x256xf32> to vector<1x222xf32>
    %60 = vector.broadcast %53 : vector<6x1xf32> to vector<6x222xf32>
    %61 = vector.broadcast %59 : vector<1x222xf32> to vector<6x222xf32>
    %62 = arith.mulf %60, %61 : vector<6x222xf32>
    %63 = arith.addf %52, %62 : vector<6x222xf32>
    %64 = vector.extract_strided_slice %0 {offsets = [0, 5], sizes = [6, 1], strides = [1, 1]} : vector<6x27xf32> to vector<6x1xf32>
    %65 = vector.extract_strided_slice %7 {offsets = [0, 18], sizes = [1, 222], strides = [1, 1]} : vector<1x256xf32> to vector<1x222xf32>
    %66 = vector.broadcast %64 : vector<6x1xf32> to vector<6x222xf32>
    %67 = vector.broadcast %65 : vector<1x222xf32> to vector<6x222xf32>
    %68 = arith.mulf %66, %67 : vector<6x222xf32>
    %69 = arith.addf %58, %68 : vector<6x222xf32>
    %70 = vector.extract_strided_slice %8 {offsets = [0, 18], sizes = [1, 222], strides = [1, 1]} : vector<1x256xf32> to vector<1x222xf32>
    %71 = vector.broadcast %64 : vector<6x1xf32> to vector<6x222xf32>
    %72 = vector.broadcast %70 : vector<1x222xf32> to vector<6x222xf32>
    %73 = arith.mulf %71, %72 : vector<6x222xf32>
    %74 = arith.addf %63, %73 : vector<6x222xf32>
    %75 = vector.extract_strided_slice %0 {offsets = [0, 6], sizes = [6, 1], strides = [1, 1]} : vector<6x27xf32> to vector<6x1xf32>
    %76 = vector.extract_strided_slice %7 {offsets = [0, 32], sizes = [1, 222], strides = [1, 1]} : vector<1x256xf32> to vector<1x222xf32>
    %77 = vector.broadcast %75 : vector<6x1xf32> to vector<6x222xf32>
    %78 = vector.broadcast %76 : vector<1x222xf32> to vector<6x222xf32>
    %79 = arith.mulf %77, %78 : vector<6x222xf32>
    %80 = arith.addf %69, %79 : vector<6x222xf32>
    %81 = vector.extract_strided_slice %8 {offsets = [0, 32], sizes = [1, 222], strides = [1, 1]} : vector<1x256xf32> to vector<1x222xf32>
    %82 = vector.broadcast %75 : vector<6x1xf32> to vector<6x222xf32>
    %83 = vector.broadcast %81 : vector<1x222xf32> to vector<6x222xf32>
    %84 = arith.mulf %82, %83 : vector<6x222xf32>
    %85 = arith.addf %74, %84 : vector<6x222xf32>
    %86 = vector.extract_strided_slice %0 {offsets = [0, 7], sizes = [6, 1], strides = [1, 1]} : vector<6x27xf32> to vector<6x1xf32>
    %87 = vector.extract_strided_slice %7 {offsets = [0, 33], sizes = [1, 222], strides = [1, 1]} : vector<1x256xf32> to vector<1x222xf32>
    %88 = vector.broadcast %86 : vector<6x1xf32> to vector<6x222xf32>
    %89 = vector.broadcast %87 : vector<1x222xf32> to vector<6x222xf32>
    %90 = arith.mulf %88, %89 : vector<6x222xf32>
    %91 = arith.addf %80, %90 : vector<6x222xf32>
    %92 = vector.extract_strided_slice %8 {offsets = [0, 33], sizes = [1, 222], strides = [1, 1]} : vector<1x256xf32> to vector<1x222xf32>
    %93 = vector.broadcast %86 : vector<6x1xf32> to vector<6x222xf32>
    %94 = vector.broadcast %92 : vector<1x222xf32> to vector<6x222xf32>
    %95 = arith.mulf %93, %94 : vector<6x222xf32>
    %96 = arith.addf %85, %95 : vector<6x222xf32>
    %97 = vector.extract_strided_slice %0 {offsets = [0, 8], sizes = [6, 1], strides = [1, 1]} : vector<6x27xf32> to vector<6x1xf32>
    %98 = vector.extract_strided_slice %7 {offsets = [0, 34], sizes = [1, 222], strides = [1, 1]} : vector<1x256xf32> to vector<1x222xf32>
    %99 = vector.broadcast %97 : vector<6x1xf32> to vector<6x222xf32>
    %100 = vector.broadcast %98 : vector<1x222xf32> to vector<6x222xf32>
    %101 = arith.mulf %99, %100 : vector<6x222xf32>
    %102 = arith.addf %91, %101 : vector<6x222xf32>
    %103 = vector.extract_strided_slice %8 {offsets = [0, 34], sizes = [1, 222], strides = [1, 1]} : vector<1x256xf32> to vector<1x222xf32>
    %104 = vector.broadcast %97 : vector<6x1xf32> to vector<6x222xf32>
    %105 = vector.broadcast %103 : vector<1x222xf32> to vector<6x222xf32>
    %106 = arith.mulf %104, %105 : vector<6x222xf32>
    %107 = arith.addf %96, %106 : vector<6x222xf32>
    %108 = vector.extract_strided_slice %2 {offsets = [1, 0], sizes = [1, 256], strides = [1, 1]} : vector<6x256xf32> to vector<1x256xf32>
    %109 = vector.extract_strided_slice %2 {offsets = [4, 0], sizes = [1, 256], strides = [1, 1]} : vector<6x256xf32> to vector<1x256xf32>
    %110 = vector.extract_strided_slice %0 {offsets = [0, 9], sizes = [6, 1], strides = [1, 1]} : vector<6x27xf32> to vector<6x1xf32>
    %111 = vector.extract_strided_slice %108 {offsets = [0, 0], sizes = [1, 222], strides = [1, 1]} : vector<1x256xf32> to vector<1x222xf32>
    %112 = vector.broadcast %110 : vector<6x1xf32> to vector<6x222xf32>
    %113 = vector.broadcast %111 : vector<1x222xf32> to vector<6x222xf32>
    %114 = arith.mulf %112, %113 : vector<6x222xf32>
    %115 = arith.addf %102, %114 : vector<6x222xf32>
    %116 = vector.extract_strided_slice %109 {offsets = [0, 0], sizes = [1, 222], strides = [1, 1]} : vector<1x256xf32> to vector<1x222xf32>
    %117 = vector.broadcast %110 : vector<6x1xf32> to vector<6x222xf32>
    %118 = vector.broadcast %116 : vector<1x222xf32> to vector<6x222xf32>
    %119 = arith.mulf %117, %118 : vector<6x222xf32>
    %120 = arith.addf %107, %119 : vector<6x222xf32>
    %121 = vector.extract_strided_slice %0 {offsets = [0, 10], sizes = [6, 1], strides = [1, 1]} : vector<6x27xf32> to vector<6x1xf32>
    %122 = vector.extract_strided_slice %108 {offsets = [0, 1], sizes = [1, 222], strides = [1, 1]} : vector<1x256xf32> to vector<1x222xf32>
    %123 = vector.broadcast %121 : vector<6x1xf32> to vector<6x222xf32>
    %124 = vector.broadcast %122 : vector<1x222xf32> to vector<6x222xf32>
    %125 = arith.mulf %123, %124 : vector<6x222xf32>
    %126 = arith.addf %115, %125 : vector<6x222xf32>
    %127 = vector.extract_strided_slice %109 {offsets = [0, 1], sizes = [1, 222], strides = [1, 1]} : vector<1x256xf32> to vector<1x222xf32>
    %128 = vector.broadcast %121 : vector<6x1xf32> to vector<6x222xf32>
    %129 = vector.broadcast %127 : vector<1x222xf32> to vector<6x222xf32>
    %130 = arith.mulf %128, %129 : vector<6x222xf32>
    %131 = arith.addf %120, %130 : vector<6x222xf32>
    %132 = vector.extract_strided_slice %0 {offsets = [0, 11], sizes = [6, 1], strides = [1, 1]} : vector<6x27xf32> to vector<6x1xf32>
    %133 = vector.extract_strided_slice %108 {offsets = [0, 2], sizes = [1, 222], strides = [1, 1]} : vector<1x256xf32> to vector<1x222xf32>
    %134 = vector.broadcast %132 : vector<6x1xf32> to vector<6x222xf32>
    %135 = vector.broadcast %133 : vector<1x222xf32> to vector<6x222xf32>
    %136 = arith.mulf %134, %135 : vector<6x222xf32>
    %137 = arith.addf %126, %136 : vector<6x222xf32>
    %138 = vector.extract_strided_slice %109 {offsets = [0, 2], sizes = [1, 222], strides = [1, 1]} : vector<1x256xf32> to vector<1x222xf32>
    %139 = vector.broadcast %132 : vector<6x1xf32> to vector<6x222xf32>
    %140 = vector.broadcast %138 : vector<1x222xf32> to vector<6x222xf32>
    %141 = arith.mulf %139, %140 : vector<6x222xf32>
    %142 = arith.addf %131, %141 : vector<6x222xf32>
    %143 = vector.extract_strided_slice %0 {offsets = [0, 12], sizes = [6, 1], strides = [1, 1]} : vector<6x27xf32> to vector<6x1xf32>
    %144 = vector.extract_strided_slice %108 {offsets = [0, 16], sizes = [1, 222], strides = [1, 1]} : vector<1x256xf32> to vector<1x222xf32>
    %145 = vector.broadcast %143 : vector<6x1xf32> to vector<6x222xf32>
    %146 = vector.broadcast %144 : vector<1x222xf32> to vector<6x222xf32>
    %147 = arith.mulf %145, %146 : vector<6x222xf32>
    %148 = arith.addf %137, %147 : vector<6x222xf32>
    %149 = vector.extract_strided_slice %109 {offsets = [0, 16], sizes = [1, 222], strides = [1, 1]} : vector<1x256xf32> to vector<1x222xf32>
    %150 = vector.broadcast %143 : vector<6x1xf32> to vector<6x222xf32>
    %151 = vector.broadcast %149 : vector<1x222xf32> to vector<6x222xf32>
    %152 = arith.mulf %150, %151 : vector<6x222xf32>
    %153 = arith.addf %142, %152 : vector<6x222xf32>
    %154 = vector.extract_strided_slice %0 {offsets = [0, 13], sizes = [6, 1], strides = [1, 1]} : vector<6x27xf32> to vector<6x1xf32>
    %155 = vector.extract_strided_slice %108 {offsets = [0, 17], sizes = [1, 222], strides = [1, 1]} : vector<1x256xf32> to vector<1x222xf32>
    %156 = vector.broadcast %154 : vector<6x1xf32> to vector<6x222xf32>
    %157 = vector.broadcast %155 : vector<1x222xf32> to vector<6x222xf32>
    %158 = arith.mulf %156, %157 : vector<6x222xf32>
    %159 = arith.addf %148, %158 : vector<6x222xf32>
    %160 = vector.extract_strided_slice %109 {offsets = [0, 17], sizes = [1, 222], strides = [1, 1]} : vector<1x256xf32> to vector<1x222xf32>
    %161 = vector.broadcast %154 : vector<6x1xf32> to vector<6x222xf32>
    %162 = vector.broadcast %160 : vector<1x222xf32> to vector<6x222xf32>
    %163 = arith.mulf %161, %162 : vector<6x222xf32>
    %164 = arith.addf %153, %163 : vector<6x222xf32>
    %165 = vector.extract_strided_slice %0 {offsets = [0, 14], sizes = [6, 1], strides = [1, 1]} : vector<6x27xf32> to vector<6x1xf32>
    %166 = vector.extract_strided_slice %108 {offsets = [0, 18], sizes = [1, 222], strides = [1, 1]} : vector<1x256xf32> to vector<1x222xf32>
    %167 = vector.broadcast %165 : vector<6x1xf32> to vector<6x222xf32>
    %168 = vector.broadcast %166 : vector<1x222xf32> to vector<6x222xf32>
    %169 = arith.mulf %167, %168 : vector<6x222xf32>
    %170 = arith.addf %159, %169 : vector<6x222xf32>
    %171 = vector.extract_strided_slice %109 {offsets = [0, 18], sizes = [1, 222], strides = [1, 1]} : vector<1x256xf32> to vector<1x222xf32>
    %172 = vector.broadcast %165 : vector<6x1xf32> to vector<6x222xf32>
    %173 = vector.broadcast %171 : vector<1x222xf32> to vector<6x222xf32>
    %174 = arith.mulf %172, %173 : vector<6x222xf32>
    %175 = arith.addf %164, %174 : vector<6x222xf32>
    %176 = vector.extract_strided_slice %0 {offsets = [0, 15], sizes = [6, 1], strides = [1, 1]} : vector<6x27xf32> to vector<6x1xf32>
    %177 = vector.extract_strided_slice %108 {offsets = [0, 32], sizes = [1, 222], strides = [1, 1]} : vector<1x256xf32> to vector<1x222xf32>
    %178 = vector.broadcast %176 : vector<6x1xf32> to vector<6x222xf32>
    %179 = vector.broadcast %177 : vector<1x222xf32> to vector<6x222xf32>
    %180 = arith.mulf %178, %179 : vector<6x222xf32>
    %181 = arith.addf %170, %180 : vector<6x222xf32>
    %182 = vector.extract_strided_slice %109 {offsets = [0, 32], sizes = [1, 222], strides = [1, 1]} : vector<1x256xf32> to vector<1x222xf32>
    %183 = vector.broadcast %176 : vector<6x1xf32> to vector<6x222xf32>
    %184 = vector.broadcast %182 : vector<1x222xf32> to vector<6x222xf32>
    %185 = arith.mulf %183, %184 : vector<6x222xf32>
    %186 = arith.addf %175, %185 : vector<6x222xf32>
    %187 = vector.extract_strided_slice %0 {offsets = [0, 16], sizes = [6, 1], strides = [1, 1]} : vector<6x27xf32> to vector<6x1xf32>
    %188 = vector.extract_strided_slice %108 {offsets = [0, 33], sizes = [1, 222], strides = [1, 1]} : vector<1x256xf32> to vector<1x222xf32>
    %189 = vector.broadcast %187 : vector<6x1xf32> to vector<6x222xf32>
    %190 = vector.broadcast %188 : vector<1x222xf32> to vector<6x222xf32>
    %191 = arith.mulf %189, %190 : vector<6x222xf32>
    %192 = arith.addf %181, %191 : vector<6x222xf32>
    %193 = vector.extract_strided_slice %109 {offsets = [0, 33], sizes = [1, 222], strides = [1, 1]} : vector<1x256xf32> to vector<1x222xf32>
    %194 = vector.broadcast %187 : vector<6x1xf32> to vector<6x222xf32>
    %195 = vector.broadcast %193 : vector<1x222xf32> to vector<6x222xf32>
    %196 = arith.mulf %194, %195 : vector<6x222xf32>
    %197 = arith.addf %186, %196 : vector<6x222xf32>
    %198 = vector.extract_strided_slice %0 {offsets = [0, 17], sizes = [6, 1], strides = [1, 1]} : vector<6x27xf32> to vector<6x1xf32>
    %199 = vector.extract_strided_slice %108 {offsets = [0, 34], sizes = [1, 222], strides = [1, 1]} : vector<1x256xf32> to vector<1x222xf32>
    %200 = vector.broadcast %198 : vector<6x1xf32> to vector<6x222xf32>
    %201 = vector.broadcast %199 : vector<1x222xf32> to vector<6x222xf32>
    %202 = arith.mulf %200, %201 : vector<6x222xf32>
    %203 = arith.addf %192, %202 : vector<6x222xf32>
    %204 = vector.extract_strided_slice %109 {offsets = [0, 34], sizes = [1, 222], strides = [1, 1]} : vector<1x256xf32> to vector<1x222xf32>
    %205 = vector.broadcast %198 : vector<6x1xf32> to vector<6x222xf32>
    %206 = vector.broadcast %204 : vector<1x222xf32> to vector<6x222xf32>
    %207 = arith.mulf %205, %206 : vector<6x222xf32>
    %208 = arith.addf %197, %207 : vector<6x222xf32>
    %209 = vector.extract_strided_slice %2 {offsets = [2, 0], sizes = [1, 256], strides = [1, 1]} : vector<6x256xf32> to vector<1x256xf32>
    %210 = vector.extract_strided_slice %2 {offsets = [5, 0], sizes = [1, 256], strides = [1, 1]} : vector<6x256xf32> to vector<1x256xf32>
    %211 = vector.extract_strided_slice %0 {offsets = [0, 18], sizes = [6, 1], strides = [1, 1]} : vector<6x27xf32> to vector<6x1xf32>
    %212 = vector.extract_strided_slice %209 {offsets = [0, 0], sizes = [1, 222], strides = [1, 1]} : vector<1x256xf32> to vector<1x222xf32>
    %213 = vector.broadcast %211 : vector<6x1xf32> to vector<6x222xf32>
    %214 = vector.broadcast %212 : vector<1x222xf32> to vector<6x222xf32>
    %215 = arith.mulf %213, %214 : vector<6x222xf32>
    %216 = arith.addf %203, %215 : vector<6x222xf32>
    %217 = vector.extract_strided_slice %210 {offsets = [0, 0], sizes = [1, 222], strides = [1, 1]} : vector<1x256xf32> to vector<1x222xf32>
    %218 = vector.broadcast %211 : vector<6x1xf32> to vector<6x222xf32>
    %219 = vector.broadcast %217 : vector<1x222xf32> to vector<6x222xf32>
    %220 = arith.mulf %218, %219 : vector<6x222xf32>
    %221 = arith.addf %208, %220 : vector<6x222xf32>
    %222 = vector.extract_strided_slice %0 {offsets = [0, 19], sizes = [6, 1], strides = [1, 1]} : vector<6x27xf32> to vector<6x1xf32>
    %223 = vector.extract_strided_slice %209 {offsets = [0, 1], sizes = [1, 222], strides = [1, 1]} : vector<1x256xf32> to vector<1x222xf32>
    %224 = vector.broadcast %222 : vector<6x1xf32> to vector<6x222xf32>
    %225 = vector.broadcast %223 : vector<1x222xf32> to vector<6x222xf32>
    %226 = arith.mulf %224, %225 : vector<6x222xf32>
    %227 = arith.addf %216, %226 : vector<6x222xf32>
    %228 = vector.extract_strided_slice %210 {offsets = [0, 1], sizes = [1, 222], strides = [1, 1]} : vector<1x256xf32> to vector<1x222xf32>
    %229 = vector.broadcast %222 : vector<6x1xf32> to vector<6x222xf32>
    %230 = vector.broadcast %228 : vector<1x222xf32> to vector<6x222xf32>
    %231 = arith.mulf %229, %230 : vector<6x222xf32>
    %232 = arith.addf %221, %231 : vector<6x222xf32>
    %233 = vector.extract_strided_slice %0 {offsets = [0, 20], sizes = [6, 1], strides = [1, 1]} : vector<6x27xf32> to vector<6x1xf32>
    %234 = vector.extract_strided_slice %209 {offsets = [0, 2], sizes = [1, 222], strides = [1, 1]} : vector<1x256xf32> to vector<1x222xf32>
    %235 = vector.broadcast %233 : vector<6x1xf32> to vector<6x222xf32>
    %236 = vector.broadcast %234 : vector<1x222xf32> to vector<6x222xf32>
    %237 = arith.mulf %235, %236 : vector<6x222xf32>
    %238 = arith.addf %227, %237 : vector<6x222xf32>
    %239 = vector.extract_strided_slice %210 {offsets = [0, 2], sizes = [1, 222], strides = [1, 1]} : vector<1x256xf32> to vector<1x222xf32>
    %240 = vector.broadcast %233 : vector<6x1xf32> to vector<6x222xf32>
    %241 = vector.broadcast %239 : vector<1x222xf32> to vector<6x222xf32>
    %242 = arith.mulf %240, %241 : vector<6x222xf32>
    %243 = arith.addf %232, %242 : vector<6x222xf32>
    %244 = vector.extract_strided_slice %0 {offsets = [0, 21], sizes = [6, 1], strides = [1, 1]} : vector<6x27xf32> to vector<6x1xf32>
    %245 = vector.extract_strided_slice %209 {offsets = [0, 16], sizes = [1, 222], strides = [1, 1]} : vector<1x256xf32> to vector<1x222xf32>
    %246 = vector.broadcast %244 : vector<6x1xf32> to vector<6x222xf32>
    %247 = vector.broadcast %245 : vector<1x222xf32> to vector<6x222xf32>
    %248 = arith.mulf %246, %247 : vector<6x222xf32>
    %249 = arith.addf %238, %248 : vector<6x222xf32>
    %250 = vector.extract_strided_slice %210 {offsets = [0, 16], sizes = [1, 222], strides = [1, 1]} : vector<1x256xf32> to vector<1x222xf32>
    %251 = vector.broadcast %244 : vector<6x1xf32> to vector<6x222xf32>
    %252 = vector.broadcast %250 : vector<1x222xf32> to vector<6x222xf32>
    %253 = arith.mulf %251, %252 : vector<6x222xf32>
    %254 = arith.addf %243, %253 : vector<6x222xf32>
    %255 = vector.extract_strided_slice %0 {offsets = [0, 22], sizes = [6, 1], strides = [1, 1]} : vector<6x27xf32> to vector<6x1xf32>
    %256 = vector.extract_strided_slice %209 {offsets = [0, 17], sizes = [1, 222], strides = [1, 1]} : vector<1x256xf32> to vector<1x222xf32>
    %257 = vector.broadcast %255 : vector<6x1xf32> to vector<6x222xf32>
    %258 = vector.broadcast %256 : vector<1x222xf32> to vector<6x222xf32>
    %259 = arith.mulf %257, %258 : vector<6x222xf32>
    %260 = arith.addf %249, %259 : vector<6x222xf32>
    %261 = vector.extract_strided_slice %210 {offsets = [0, 17], sizes = [1, 222], strides = [1, 1]} : vector<1x256xf32> to vector<1x222xf32>
    %262 = vector.broadcast %255 : vector<6x1xf32> to vector<6x222xf32>
    %263 = vector.broadcast %261 : vector<1x222xf32> to vector<6x222xf32>
    %264 = arith.mulf %262, %263 : vector<6x222xf32>
    %265 = arith.addf %254, %264 : vector<6x222xf32>
    %266 = vector.extract_strided_slice %0 {offsets = [0, 23], sizes = [6, 1], strides = [1, 1]} : vector<6x27xf32> to vector<6x1xf32>
    %267 = vector.extract_strided_slice %209 {offsets = [0, 18], sizes = [1, 222], strides = [1, 1]} : vector<1x256xf32> to vector<1x222xf32>
    %268 = vector.broadcast %266 : vector<6x1xf32> to vector<6x222xf32>
    %269 = vector.broadcast %267 : vector<1x222xf32> to vector<6x222xf32>
    %270 = arith.mulf %268, %269 : vector<6x222xf32>
    %271 = arith.addf %260, %270 : vector<6x222xf32>
    %272 = vector.extract_strided_slice %210 {offsets = [0, 18], sizes = [1, 222], strides = [1, 1]} : vector<1x256xf32> to vector<1x222xf32>
    %273 = vector.broadcast %266 : vector<6x1xf32> to vector<6x222xf32>
    %274 = vector.broadcast %272 : vector<1x222xf32> to vector<6x222xf32>
    %275 = arith.mulf %273, %274 : vector<6x222xf32>
    %276 = arith.addf %265, %275 : vector<6x222xf32>
    %277 = vector.extract_strided_slice %0 {offsets = [0, 24], sizes = [6, 1], strides = [1, 1]} : vector<6x27xf32> to vector<6x1xf32>
    %278 = vector.extract_strided_slice %209 {offsets = [0, 32], sizes = [1, 222], strides = [1, 1]} : vector<1x256xf32> to vector<1x222xf32>
    %279 = vector.broadcast %277 : vector<6x1xf32> to vector<6x222xf32>
    %280 = vector.broadcast %278 : vector<1x222xf32> to vector<6x222xf32>
    %281 = arith.mulf %279, %280 : vector<6x222xf32>
    %282 = arith.addf %271, %281 : vector<6x222xf32>
    %283 = vector.extract_strided_slice %210 {offsets = [0, 32], sizes = [1, 222], strides = [1, 1]} : vector<1x256xf32> to vector<1x222xf32>
    %284 = vector.broadcast %277 : vector<6x1xf32> to vector<6x222xf32>
    %285 = vector.broadcast %283 : vector<1x222xf32> to vector<6x222xf32>
    %286 = arith.mulf %284, %285 : vector<6x222xf32>
    %287 = arith.addf %276, %286 : vector<6x222xf32>
    %288 = vector.extract_strided_slice %0 {offsets = [0, 25], sizes = [6, 1], strides = [1, 1]} : vector<6x27xf32> to vector<6x1xf32>
    %289 = vector.extract_strided_slice %209 {offsets = [0, 33], sizes = [1, 222], strides = [1, 1]} : vector<1x256xf32> to vector<1x222xf32>
    %290 = vector.broadcast %288 : vector<6x1xf32> to vector<6x222xf32>
    %291 = vector.broadcast %289 : vector<1x222xf32> to vector<6x222xf32>
    %292 = arith.mulf %290, %291 : vector<6x222xf32>
    %293 = arith.addf %282, %292 : vector<6x222xf32>
    %294 = vector.extract_strided_slice %210 {offsets = [0, 33], sizes = [1, 222], strides = [1, 1]} : vector<1x256xf32> to vector<1x222xf32>
    %295 = vector.broadcast %288 : vector<6x1xf32> to vector<6x222xf32>
    %296 = vector.broadcast %294 : vector<1x222xf32> to vector<6x222xf32>
    %297 = arith.mulf %295, %296 : vector<6x222xf32>
    %298 = arith.addf %287, %297 : vector<6x222xf32>
    %299 = vector.extract_strided_slice %0 {offsets = [0, 26], sizes = [6, 1], strides = [1, 1]} : vector<6x27xf32> to vector<6x1xf32>
    %300 = vector.extract_strided_slice %209 {offsets = [0, 34], sizes = [1, 222], strides = [1, 1]} : vector<1x256xf32> to vector<1x222xf32>
    %301 = vector.broadcast %299 : vector<6x1xf32> to vector<6x222xf32>
    %302 = vector.broadcast %300 : vector<1x222xf32> to vector<6x222xf32>
    %303 = arith.mulf %301, %302 : vector<6x222xf32>
    %304 = arith.addf %293, %303 : vector<6x222xf32>
    %305 = vector.extract_strided_slice %210 {offsets = [0, 34], sizes = [1, 222], strides = [1, 1]} : vector<1x256xf32> to vector<1x222xf32>
    %306 = vector.broadcast %299 : vector<6x1xf32> to vector<6x222xf32>
    %307 = vector.broadcast %305 : vector<1x222xf32> to vector<6x222xf32>
    %308 = arith.mulf %306, %307 : vector<6x222xf32>
    %309 = arith.addf %298, %308 : vector<6x222xf32>
    %c0_5 = arith.constant 0 : index
    %c0_6 = arith.constant 0 : index
    %c0_7 = arith.constant 0 : index
    %310 = vector.load %arg3[%c0_5, %c0_6, %c0_7] : memref<2x6x222xf32, #tpu.memory_space<vmem>>, vector<1x6x222xf32>
    %311 = vector.shape_cast %310 : vector<1x6x222xf32> to vector<6x222xf32>
    %312 = vector.shape_cast %304 : vector<6x222xf32> to vector<1x6x222xf32>
    tpu.vector_store %arg3[%c0_5, %c0_6, %c0_7], %312 {strides = array<i32>} : memref<2x6x222xf32, #tpu.memory_space<vmem>>, vector<1x6x222xf32>,
    %c1 = arith.constant 1 : index
    %c0_8 = arith.constant 0 : index
    %c0_9 = arith.constant 0 : index
    %313 = vector.load %arg3[%c1, %c0_8, %c0_9] : memref<2x6x222xf32, #tpu.memory_space<vmem>>, vector<1x6x222xf32>
    %314 = vector.shape_cast %313 : vector<1x6x222xf32> to vector<6x222xf32>
    %315 = vector.shape_cast %309 : vector<6x222xf32> to vector<1x6x222xf32>
    tpu.vector_store %arg3[%c1, %c0_8, %c0_9], %315 {strides = array<i32>} : memref<2x6x222xf32, #tpu.memory_space<vmem>>, vector<1x6x222xf32>,
    return
  }
}

</mosaic_0001>

<bundles_post_ra>
// kernel: tudui_forward.1
= control target key start
LH: loop header
LB: loop body
LE: loop exit
PB: predicated region body
PF: predicated region fallthrough
CT: control target
= control target key end

     0   :  { %v911_v0 = vmov 1   ;;  %v912_v1 = vmov 0   ;;  %v913_v4 = vmov 2   ;;  %v914_v5 = vmov 3   ;;  %s926_s18 = smov 126   ;;  %s927_s19 = smov 112   ;;  %s1406_s1 = inlined_call_operand.vmem [shape: f32[6,1], index: 1, kind: input, shape index: {}]   ;;  %s1407_s0 = inlined_call_operand.vmem [shape: f32[6,27], index: 0, kind: input, shape index: {}]   ;;  %s1408_s2 = inlined_call_operand.vmem [shape: f32[6,256], index: 2, kind: input, shape index: {}]   ;;  %s1409_s3 = inlined_call_operand.vmem [shape: f32[2,6,222], index: 3, kind: output, shape index: {}]  }
   0x1   :  { %884 = vset.pattern.permute.xlu1 %v911_v0  ;;  %883 = vset.pattern.permute.xlu0 %v912_v1  ;;  %v15_v2 = vld [vmem:[%s1406_s1] sm:$0x3f]  ;;  %v915_v6 = vmov 10   ;;  %v916_v7 = vmov 4   ;;  %v917_v8 = vmov 11   ;;  %v918_v9 = vmov 5  }
   0x2   :  { %v972_v3 = vld [vmem:[%s1407_s0] sm:$0x3f]  ;;  %20 = vperm.xlu0 %883, %v15_v2   ;;  %v919_v10 = vmov 6   ;;  %v920_v11 = vmov 7   ;;  %v921_v12 = vmov 8   ;;  %v922_v13 = vmov 9  }
   0x3   :  { %53 = vperm.xlu1 %884, %v972_v3   ;;  %v923_v14 = vmov 12   ;;  %v924_v15 = vmov 13   ;;  %v28_v16 = vlaneseq  ;;  %v993_v19 = vld [vmem:[%s1408_s2] sm:$0x3f]  ;;  %v998_v20 = vld [vmem:[%s1408_s2 + $0x8] sm:$0x3f] }
   0x4   :  { %s925_s2 = smov 127   ;;  %s928_s20 = smov 111   ;;  %vm64_vm0 = vcmask 1039360   ;;  %vm95_vm1 = vcmask 1031168   ;;  %vm126_vm2 = vcmask 916480   ;;  %vm157_vm3 = vcmask 908288  }
   0x5   :  { %v987_v17 = vshrl.u32 %v28_v16, 7  ;;  %s929_s21 = smov 110   ;;  %s930_s22 = smov 96   ;;  %vm188_vm4 = vcmask 900096   ;;  %vm219_vm5 = vcmask 785408   ;;  %vm250_vm6 = vcmask 777216  }
   0x6   :  { %25 = vperm.xlu0 %883, %v972_v3   ;;  %s931_s23 = smov 95   ;;  %s932_s24 = smov 94   ;;  %vm281_vm7 = vcmask 769024   ;;  %vm837_vm8 = vcmask 766976  }
   0x7   :  { %885 = vset.pattern.permute.xlu1 %v913_v4  ;;  %v30_v18 = vsub.s32 0, %v987_v17  ;;  %v42_v23 = vsub.s32 3, %v987_v17  ;;  %v306_v52 = vsub.s32 1, %v987_v17  ;;  %v318_v59 = vsub.s32 4, %v987_v17 }
   0x8   :  { %84 = vperm.xlu1 %885, %v972_v3  }
   0x9   :  { %v1001_v21 = vrot.slane %v993_v19, %v30_v18  ;;  %v1004_v22 = vrot.slane %v998_v20, %v30_v18  ;;  %v1012_v28 = vrot.slane %v993_v19, %v42_v23  ;;  %v1015_v29 = vrot.slane %v998_v20, %v42_v23 }
   0xa   :  { %886 = vset.pattern.permute.xlu0 %v914_v5  ;;  %v1056_v56 = vrot.slane %v998_v20, %v306_v52  ;;  %v1065_v62 = vrot.slane %v998_v20, %v318_v59  ;;  %v1072_v2 = vrot.slane %v993_v19, %v306_v52 }
   0xb   :  { %115 = vperm.xlu0 %886, %v972_v3  }
   0xc   :  { %893 = vset.pattern.permute.xlu1 %v915_v6 }
   0xd   :  { %329 = vperm.xlu1 %893, %v972_v3  }
   0xf   :  { %887 = vset.pattern.permute.xlu0 %v916_v7  ;;  %v1083_v7 = vrot.slane %v993_v19, %v318_v59 }
  0x10   :  { %146 = vperm.xlu0 %887, %v972_v3  }
  0x11   :  { %894 = vset.pattern.permute.xlu1 %v917_v8 }
  0x12   :  { %359 = vperm.xlu1 %894, %v972_v3  }
  0x14   :  { %888 = vset.pattern.permute.xlu0 %v918_v9 }
  0x15   :  { %177 = vperm.xlu0 %888, %v972_v3  }
  0x19   :  { %889 = vset.pattern.permute.xlu0 %v919_v10 }
  0x1a   :  { %208 = vperm.xlu0 %889, %v972_v3  }
  0x1e   :  { %890 = vset.pattern.permute.xlu0 %v920_v11 }
  0x1f   :  { %239 = vperm.xlu0 %890, %v972_v3  }
  0x23   :  { %891 = vset.pattern.permute.xlu0 %v921_v12 }
  0x24   :  { %270 = vperm.xlu0 %891, %v972_v3  }
  0x28   :  { %892 = vset.pattern.permute.xlu0 %v922_v13 }
  0x29   :  { %301 = vperm.xlu0 %892, %v972_v3  }
  0x2d   :  { %895 = vset.pattern.permute.xlu0 %v923_v14 }
  0x2e   :  { %389 = vperm.xlu0 %895, %v972_v3  }
  0x32   :  { %896 = vset.pattern.permute.xlu0 %v924_v15  ;;  %v933_v15 = vmov 14  }
  0x33   :  { %897 = vset.pattern.permute.xlu1 %v933_v15 }
  0x7d   :  { %v1007_v24 = vpop.permute.xlu0 %20 }
  0x7e   :  { %v54_v25 = vpop.permute.xlu1 %53 }
  0x7f   :  { %v56_v26 = vmul.f32 %v54_v25, %v1001_v21  ;;  %v57_v27 = vmul.f32 %v54_v25, %v1004_v22  ;;  %v70_v31 = vmul.f32 %v54_v25, %v1012_v28  ;;  %v71_v32 = vmul.f32 %v54_v25, %v1015_v29 }
  0x80   :  { %v934_v25 = vmov 15  }
  0x81   :  { %60 = vrot.lane.b32.xlu1 %v56_v26, %s925_s2  ;;  %62 = vrot.lane.b32.xlu0 %v57_v27, %s925_s2  ;;  %v1019_v30 = vpop.permute.xlu0 %25 }
  0x83   :  { %v85_v33 = vpop.permute.xlu1 %84 }
  0x84   :  { %v88_v34 = vmul.f32 %v85_v33, %v1004_v22  ;;  %v87_v35 = vmul.f32 %v85_v33, %v1001_v21  ;;  %v102_v37 = vmul.f32 %v85_v33, %v1015_v29  ;;  %v101_v38 = vmul.f32 %v85_v33, %v1012_v28 }
  0x85   :  { %74 = vrot.lane.b32.xlu1 %v70_v31, %s925_s2  ;;  %76 = vrot.lane.b32.xlu0 %v71_v32, %s925_s2 }
  0x86   :  { %v116_v36 = vpop.permute.xlu0 %115 }
  0x87   :  { %v132_v40 = vmul.f32 %v116_v36, %v1012_v28  ;;  %v118_v41 = vmul.f32 %v116_v36, %v1001_v21  ;;  %v119_v43 = vmul.f32 %v116_v36, %v1004_v22  ;;  %v133_v46 = vmul.f32 %v116_v36, %v1015_v29 }
  0x88   :  { %v330_v57 = vpop.permute.xlu1 %329 }
  0x89   :  { %93 = vrot.lane.b32.xlu1 %v88_v34, %s926_s18  ;;  %91 = vrot.lane.b32.xlu0 %v87_v35, %s926_s18  ;;  %v333_v60 = vmul.f32 %v330_v57, %v1056_v56  ;;  %v346_v1 = vmul.f32 %v330_v57, %v1065_v62  ;;  %v332_v31 = vmul.f32 %v330_v57, %v1072_v2 }
  0x8a   :  { %v345_v32 = vmul.f32 %v330_v57, %v1083_v7 }
  0x8b   :  { %v147_v39 = vpop.permute.xlu0 %146 }
  0x8c   :  { %v163_v44 = vmul.f32 %v147_v39, %v1012_v28  ;;  %v149_v48 = vmul.f32 %v147_v39, %v1001_v21  ;;  %v150_v53 = vmul.f32 %v147_v39, %v1004_v22  ;;  %v164_v58 = vmul.f32 %v147_v39, %v1015_v29 }
  0x8d   :  { %107 = vrot.lane.b32.xlu1 %v102_v37, %s926_s18  ;;  %105 = vrot.lane.b32.xlu0 %v101_v38, %s926_s18  ;;  %v360_v63 = vpop.permute.xlu1 %359  ;;  %v37_v37 = vmul.f32 %v1004_v22, %v1019_v30  ;;  %v36_v39 = vmul.f32 %v1001_v21, %v1019_v30 }
  0x8e   :  { %v362_v5 = vmul.f32 %v360_v63, %v1072_v2  ;;  %v375_v10 = vmul.f32 %v360_v63, %v1083_v7  ;;  %v363_v33 = vmul.f32 %v360_v63, %v1056_v56  ;;  %v376_v34 = vmul.f32 %v360_v63, %v1065_v62 }
  0x90   :  { %v178_v42 = vpop.permute.xlu0 %177 }
  0x91   :  { %136 = vrot.lane.b32.xlu0 %v132_v40, %s927_s19  ;;  %122 = vrot.lane.b32.xlu1 %v118_v41, %s927_s19  ;;  %v194_v47 = vmul.f32 %v178_v42, %v1012_v28  ;;  %v180_v61 = vmul.f32 %v178_v42, %v1001_v21  ;;  %v181_v0 = vmul.f32 %v178_v42, %v1004_v22 }
  0x92   :  { %v195_v6 = vmul.f32 %v178_v42, %v1015_v29  ;;  %v39_v40 = vadd.f32 %v37_v37, %v1007_v24  ;;  %v49_v41 = vmul.f32 %v1015_v29, %v1019_v30 }
  0x95   :  { %124 = vrot.lane.b32.xlu1 %v119_v43, %s927_s19  ;;  %167 = vrot.lane.b32.xlu0 %v163_v44, %s928_s20  ;;  %v209_v45 = vpop.permute.xlu0 %208  ;;  %v38_v43 = vadd.f32 %v36_v39, %v1007_v24 }
  0x96   :  { %v225_v49 = vmul.f32 %v209_v45, %v1012_v28  ;;  %v211_v9 = vmul.f32 %v209_v45, %v1001_v21  ;;  %v212_v12 = vmul.f32 %v209_v45, %v1004_v22  ;;  %v226_v13 = vmul.f32 %v209_v45, %v1015_v29 }
  0x99   :  { %138 = vrot.lane.b32.xlu1 %v133_v46, %s927_s19  ;;  %198 = vrot.lane.b32.xlu0 %v194_v47, %s929_s21 }
  0x9a   :  { %v240_v50 = vpop.permute.xlu0 %239 }
  0x9b   :  { %v256_v51 = vmul.f32 %v240_v50, %v1012_v28  ;;  %v242_v14 = vmul.f32 %v240_v50, %v1001_v21  ;;  %v243_v16 = vmul.f32 %v240_v50, %v1004_v22  ;;  %v257_v18 = vmul.f32 %v240_v50, %v1015_v29 }
  0x9d   :  { %153 = vrot.lane.b32.xlu1 %v149_v48, %s928_s20  ;;  %229 = vrot.lane.b32.xlu0 %v225_v49, %s930_s22 }
  0x9f   :  { %v271_v54 = vpop.permute.xlu0 %270 }
  0xa0   :  { %v287_v55 = vmul.f32 %v271_v54, %v1012_v28  ;;  %v273_v23 = vmul.f32 %v271_v54, %v1001_v21  ;;  %v274_v26 = vmul.f32 %v271_v54, %v1004_v22  ;;  %v288_v27 = vmul.f32 %v271_v54, %v1015_v29 }
  0xa1   :  { %155 = vrot.lane.b32.xlu1 %v150_v53, %s928_s20  ;;  %260 = vrot.lane.b32.xlu0 %v256_v51, %s931_s23  ;;  %v48_v22 = vmul.f32 %v1012_v28, %v1019_v30  ;;  %v51_v21 = vadd.f32 %v49_v41, %v1007_v24 }
  0xa3   :  { %v50_v49 = vadd.f32 %v48_v22, %v1007_v24 }
  0xa4   :  { %v1074_v4 = vpop.permute.xlu0 %301 }
  0xa5   :  { %169 = vrot.lane.b32.xlu1 %v164_v58, %s928_s20  ;;  %291 = vrot.lane.b32.xlu0 %v287_v55, %s932_s24 }
  0xa9   :  { %184 = vrot.lane.b32.xlu1 %v180_v61, %s929_s21  ;;  %338 = vrot.lane.b32.xlu0 %v333_v60, %s925_s2  ;;  %v390_v8 = vpop.permute.xlu0 %389 }
  0xaa   :  { %v405_v11 = vmul.f32 %v390_v8, %v1083_v7  ;;  %v392_v35 = vmul.f32 %v390_v8, %v1072_v2  ;;  %v393_v36 = vmul.f32 %v390_v8, %v1056_v56  ;;  %v406_v38 = vmul.f32 %v390_v8, %v1065_v62 }
  0xad   :  { %186 = vrot.lane.b32.xlu1 %v181_v0, %s929_s21  ;;  %351 = vrot.lane.b32.xlu0 %v346_v1, %s925_s2 }
  0xb1   :  { %200 = vrot.lane.b32.xlu1 %v195_v6, %s929_s21  ;;  %366 = vrot.lane.b32.xlu0 %v362_v5, %s926_s18 }
  0xb5   :  { %215 = vrot.lane.b32.xlu1 %v211_v9, %s930_s22  ;;  %379 = vrot.lane.b32.xlu0 %v375_v10, %s926_s18 }
  0xb9   :  { %217 = vrot.lane.b32.xlu1 %v212_v12, %s930_s22  ;;  %409 = vrot.lane.b32.xlu0 %v405_v11, %s927_s19 }
  0xbd   :  { %231 = vrot.lane.b32.xlu1 %v226_v13, %s930_s22  ;;  %419 = vperm.xlu0 %896, %v972_v3  }
  0xc1   :  { %246 = vrot.lane.b32.xlu1 %v242_v14, %s931_s23  ;;  %898 = vset.pattern.permute.xlu0 %v934_v25 }
  0xc5   :  { %248 = vrot.lane.b32.xlu1 %v243_v16, %s931_s23 }
  0xc9   :  { %262 = vrot.lane.b32.xlu1 %v257_v18, %s931_s23 }
  0xcd   :  { %277 = vrot.lane.b32.xlu1 %v273_v23, %s932_s24 }
  0xd1   :  { %279 = vrot.lane.b32.xlu1 %v274_v26, %s932_s24 }
  0xd5   :  { %293 = vrot.lane.b32.xlu1 %v288_v27, %s932_s24 }
  0xd9   :  { %336 = vrot.lane.b32.xlu1 %v332_v31, %s925_s2 }
  0xdd   :  { %349 = vrot.lane.b32.xlu1 %v345_v32, %s925_s2 }
  0xe1   :  { %368 = vrot.lane.b32.xlu1 %v363_v33, %s926_s18 }
  0xe5   :  { %381 = vrot.lane.b32.xlu1 %v376_v34, %s926_s18 }
  0xe9   :  { %396 = vrot.lane.b32.xlu1 %v392_v35, %s927_s19 }
  0xed   :  { %398 = vrot.lane.b32.xlu1 %v393_v36, %s927_s19 }
  0xf1   :  { %411 = vrot.lane.b32.xlu1 %v406_v38, %s927_s19 }
  0xf3   :  { %v61_v42 = vpop.permute.xlu1 %60  ;;  %v63_v44 = vpop.permute.xlu0 %62 }
  0xf4   :  { %v65_v45 = vsel %vm64_vm0, %v61_v42, %v63_v44  ;;  %v69_v46 = vadd.f32 %v63_v44, %v39_v40 }
  0xf5   :  { %v68_v47 = vadd.f32 %v65_v45, %v38_v43 }
  0xf7   :  { %v75_v48 = vpop.permute.xlu1 %74  ;;  %v77_v50 = vpop.permute.xlu0 %76 }
  0xf8   :  { %v78_v51 = vsel %vm64_vm0, %v75_v48, %v77_v50  ;;  %v82_v29 = vadd.f32 %v77_v50, %v51_v21 }
  0xf9   :  { %v81_v52 = vadd.f32 %v78_v51, %v50_v49 }
  0xfb   :  { %v94_v53 = vpop.permute.xlu1 %93  ;;  %v92_v54 = vpop.permute.xlu0 %91 }
  0xfc   :  { %v96_v55 = vsel %vm95_vm1, %v92_v54, %v94_v53  ;;  %v100_v38 = vadd.f32 %v94_v53, %v69_v46 }
  0xfd   :  { %v99_v28 = vadd.f32 %v96_v55, %v68_v47 }
  0xff   :  { %v108_v30 = vpop.permute.xlu1 %107  ;;  %v106_v57 = vpop.permute.xlu0 %105 }
 0x100   :  { %v109_v58 = vsel %vm95_vm1, %v106_v57, %v108_v30  ;;  %v113_v33 = vadd.f32 %v108_v30, %v82_v29 }
 0x101   :  { %v112_v59 = vadd.f32 %v109_v58, %v81_v52 }
 0x103   :  { %v123_v60 = vpop.permute.xlu1 %122  ;;  %v137_v61 = vpop.permute.xlu0 %136 }
 0x107   :  { %v125_v63 = vpop.permute.xlu1 %124  ;;  %v168_v24 = vpop.permute.xlu0 %167 }
 0x108   :  { %v127_v39 = vsel %vm126_vm2, %v123_v60, %v125_v63  ;;  %v131_v43 = vadd.f32 %v125_v63, %v100_v38 }
 0x109   :  { %v130_v47 = vadd.f32 %v127_v39, %v99_v28 }
 0x10b   :  { %v139_v0 = vpop.permute.xlu1 %138  ;;  %v199_v1 = vpop.permute.xlu0 %198 }
 0x10c   :  { %v140_v5 = vsel %vm126_vm2, %v137_v61, %v139_v0  ;;  %v144_v35 = vadd.f32 %v139_v0, %v113_v33 }
 0x10d   :  { %v143_v6 = vadd.f32 %v140_v5, %v112_v59 }
 0x10f   :  { %v154_v8 = vpop.permute.xlu1 %153  ;;  %v230_v9 = vpop.permute.xlu0 %229 }
 0x113   :  { %v156_v10 = vpop.permute.xlu1 %155  ;;  %v261_v11 = vpop.permute.xlu0 %260 }
 0x114   :  { %v158_v44 = vsel %vm157_vm3, %v154_v8, %v156_v10  ;;  %v162_v48 = vadd.f32 %v156_v10, %v131_v43 }
 0x115   :  { %v161_v50 = vadd.f32 %v158_v44, %v130_v47 }
 0x117   :  { %v170_v12 = vpop.permute.xlu1 %169  ;;  %v1139_v13 = vpop.permute.xlu0 %291 }
 0x118   :  { %v171_v14 = vsel %vm157_vm3, %v168_v24, %v170_v12  ;;  %v175_v37 = vadd.f32 %v170_v12, %v144_v35 }
 0x119   :  { %v174_v15 = vadd.f32 %v171_v14, %v143_v6  ;;  %v312_v14 = vmul.f32 %v1072_v2, %v1074_v4 }
 0x11b   :  { %v185_v16 = vpop.permute.xlu1 %184  ;;  %v1142_v18 = vpop.permute.xlu0 %338 }
 0x11f   :  { %v187_v23 = vpop.permute.xlu1 %186  ;;  %v1144_v25 = vpop.permute.xlu0 %351 }
 0x120   :  { %v189_v49 = vsel %vm188_vm4, %v185_v16, %v187_v23  ;;  %v193_v51 = vadd.f32 %v187_v23, %v162_v48  ;;  %v940_v48 = vmov 20  }
 0x121   :  { %v192_v53 = vadd.f32 %v189_v49, %v161_v50 }
 0x123   :  { %v201_v26 = vpop.permute.xlu1 %200  ;;  %v1147_v34 = vpop.permute.xlu0 %366 }
 0x124   :  { %v202_v27 = vsel %vm188_vm4, %v199_v1, %v201_v26  ;;  %v206_v40 = vadd.f32 %v201_v26, %v175_v37  ;;  %v325_v26 = vmul.f32 %v1065_v62, %v1074_v4  ;;  %v324_v37 = vmul.f32 %v1083_v7, %v1074_v4 }
 0x125   :  { %v205_v31 = vadd.f32 %v202_v27, %v174_v15  ;;  %v936_v27 = vmov 16  }
 0x127   :  { %v216_v32 = vpop.permute.xlu1 %215  ;;  %v1150_v41 = vpop.permute.xlu0 %379 }
 0x12b   :  { %v218_v36 = vpop.permute.xlu1 %217  ;;  %v1156_v52 = vpop.permute.xlu0 %409 }
 0x12c   :  { %v220_v29 = vsel %vm219_vm5, %v216_v32, %v218_v36  ;;  %v224_v54 = vadd.f32 %v218_v36, %v193_v51  ;;  %v937_v36 = vmov 22  }
 0x12d   :  { %v223_v55 = vadd.f32 %v220_v29, %v192_v53  ;;  %v942_v29 = vmov 21  }
 0x12f   :  { %v232_v42 = vpop.permute.xlu1 %231 }
 0x130   :  { %v233_v22 = vsel %vm219_vm5, %v230_v9, %v232_v42  ;;  %v237_v45 = vadd.f32 %v232_v42, %v206_v40  ;;  %v935_v9 = vmov 19  }
 0x131   :  { %v236_v21 = vadd.f32 %v233_v22, %v205_v31 }
 0x133   :  { %v247_v46 = vpop.permute.xlu1 %246 }
 0x137   :  { %v249_v30 = vpop.permute.xlu1 %248 }
 0x138   :  { %v251_v57 = vsel %vm250_vm6, %v247_v46, %v249_v30  ;;  %v255_v58 = vadd.f32 %v249_v30, %v224_v54  ;;  %v1159_v28 = vpop.permute.xlu0 %419 }
 0x139   :  { %v254_v59 = vadd.f32 %v251_v57, %v223_v55  ;;  %v435_v60 = vmul.f32 %v1159_v28, %v1083_v7  ;;  %v422_v61 = vmul.f32 %v1159_v28, %v1072_v2  ;;  %v423_v5 = vmul.f32 %v1159_v28, %v1056_v56 }
 0x13a   :  { %v943_v57 = vmov 23  }
 0x13b   :  { %v263_v63 = vpop.permute.xlu1 %262  ;;  %439 = vrot.lane.b32.xlu0 %v435_v60, %s928_s20  ;;  %426 = vrot.lane.b32.xlu1 %v422_v61, %s928_s20  ;;  %v944_v60 = vmov 24  }
 0x13c   :  { %v264_v24 = vsel %vm250_vm6, %v261_v11, %v263_v63  ;;  %v268_v0 = vadd.f32 %v263_v63, %v237_v45  ;;  %v313_v11 = vmul.f32 %v1056_v56, %v1074_v4  ;;  %v939_v45 = vmov 25  }
 0x13d   :  { %v267_v1 = vadd.f32 %v264_v24, %v236_v21 }
 0x13f   :  { %v278_v6 = vpop.permute.xlu1 %277  ;;  %428 = vrot.lane.b32.xlu1 %v423_v5, %s928_s20  ;;  %479 = vperm.xlu0 %898, %v972_v3  }
 0x143   :  { %v280_v8 = vpop.permute.xlu1 %279  ;;  %449 = vperm.xlu1 %897, %v972_v3   ;;  %901 = vset.pattern.permute.xlu0 %v935_v9 }
 0x144   :  { %v282_v10 = vsel %vm281_vm7, %v278_v6, %v280_v8  ;;  %v286_v12 = vadd.f32 %v280_v8, %v255_v58  ;;  %597 = vperm.xlu0 %901, %v972_v3  }
 0x145   :  { %v285_v15 = vadd.f32 %v282_v10, %v254_v59 }
 0x146   :  { %v315_v16 = vadd.f32 %v313_v11, %v286_v12 }
 0x147   :  { %v294_v23 = vpop.permute.xlu1 %293  ;;  %899 = vset.pattern.permute.xlu1 %v936_v27  ;;  %v314_v31 = vadd.f32 %v312_v14, %v285_v15 }
 0x148   :  { %v295_v32 = vsel %vm281_vm7, %v1139_v13, %v294_v23  ;;  %v299_v33 = vadd.f32 %v294_v23, %v268_v0  ;;  %509 = vperm.xlu1 %899, %v972_v3   ;;  %v344_v35 = vadd.f32 %v1142_v18, %v315_v16  ;;  %904 = vset.pattern.permute.xlu0 %v937_v36  ;;  %v938_v13 = vmov 17  }
 0x149   :  { %v298_v38 = vadd.f32 %v295_v32, %v267_v1  ;;  %687 = vperm.xlu0 %904, %v972_v3   ;;  %v436_v0 = vmul.f32 %v1159_v28, %v1065_v62  ;;  %v945_v1 = vmov 18  }
 0x14a   :  { %v327_v39 = vadd.f32 %v325_v26, %v299_v33 }
 0x14b   :  { %v337_v40 = vpop.permute.xlu1 %336  ;;  %v326_v42 = vadd.f32 %v324_v37, %v298_v38 }
 0x14c   :  { %v340_v43 = vsel %vm64_vm0, %v337_v40, %v1142_v18  ;;  %900 = vset.pattern.permute.xlu1 %v938_v13  ;;  %v357_v44 = vadd.f32 %v1144_v25, %v327_v39  ;;  %v941_v18 = vmov 26  }
 0x14d   :  { %v343_v22 = vadd.f32 %v340_v43, %v314_v31  ;;  %539 = vperm.xlu1 %900, %v972_v3   ;;  %907 = vset.pattern.permute.xlu0 %v939_v45 }
 0x14e   :  { %777 = vperm.xlu0 %907, %v972_v3  }
 0x14f   :  { %v350_v4 = vpop.permute.xlu1 %349 }
 0x150   :  { %v353_v47 = vsel %vm64_vm0, %v350_v4, %v1144_v25 }
 0x151   :  { %v356_v21 = vadd.f32 %v353_v47, %v326_v42  ;;  %902 = vset.pattern.permute.xlu1 %v940_v48  ;;  %v574_v42 = vsub.s32 2, %v987_v17 }
 0x152   :  { %627 = vperm.xlu1 %902, %v972_v3   ;;  %910 = vset.pattern.permute.xlu0 %v941_v18 }
 0x153   :  { %v369_v49 = vpop.permute.xlu1 %368  ;;  %v1258_v47 = vrot.slane %v998_v20, %v574_v42 }
 0x154   :  { %v370_v50 = vsel %vm95_vm1, %v1147_v34, %v369_v49  ;;  %v374_v46 = vadd.f32 %v369_v49, %v344_v35 }
 0x155   :  { %v373_v51 = vadd.f32 %v370_v50, %v343_v22  ;;  %v1253_v22 = vrot.slane %v993_v19, %v574_v42 }
 0x156   :  { %903 = vset.pattern.permute.xlu1 %v942_v29 }
 0x157   :  { %v382_v53 = vpop.permute.xlu1 %381  ;;  %657 = vperm.xlu1 %903, %v972_v3  }
 0x158   :  { %v383_v25 = vsel %vm95_vm1, %v1150_v41, %v382_v53  ;;  %v1201_v54 = vadd.f32 %v382_v53, %v357_v44 }
 0x159   :  { %v386_v55 = vadd.f32 %v383_v25, %v356_v21 }
 0x15b   :  { %v397_v30 = vpop.permute.xlu1 %396  ;;  %905 = vset.pattern.permute.xlu1 %v943_v57 }
 0x15c   :  { %717 = vperm.xlu1 %905, %v972_v3  }
 0x15f   :  { %v399_v58 = vpop.permute.xlu1 %398 }
 0x160   :  { %v400_v34 = vsel %vm126_vm2, %v397_v30, %v399_v58  ;;  %v404_v59 = vadd.f32 %v399_v58, %v374_v46  ;;  %906 = vset.pattern.permute.xlu1 %v944_v60 }
 0x161   :  { %v403_v61 = vadd.f32 %v400_v34, %v373_v51  ;;  %747 = vperm.xlu1 %906, %v972_v3  }
 0x163   :  { %v1206_v63 = vpop.permute.xlu1 %411 }
 0x164   :  { %v413_v41 = vsel %vm126_vm2, %v1156_v52, %v1206_v63 }
 0x165   :  { %v1211_v24 = vadd.f32 %v413_v41, %v386_v55  ;;  %908 = vset.pattern.permute.xlu1 %v941_v18 }
 0x166   :  { %807 = vperm.xlu1 %908, %v972_v3  }
 0x16a   :  { %441 = vrot.lane.b32.xlu1 %v436_v0, %s928_s20 }
 0x16b   :  { %909 = vset.pattern.permute.xlu1 %v945_v1 }
 0x1ad   :  { %v427_v5 = vpop.permute.xlu1 %426  ;;  %v440_v52 = vpop.permute.xlu0 %439 }
 0x1b1   :  { %v429_v6 = vpop.permute.xlu1 %428 }
 0x1b2   :  { %v430_v8 = vsel %vm157_vm3, %v427_v5, %v429_v6  ;;  %v1218_v9 = vadd.f32 %v429_v6, %v404_v59 }
 0x1b3   :  { %v1220_v10 = vadd.f32 %v430_v8, %v403_v61 }
 0x1ba   :  { %v480_v28 = vpop.permute.xlu0 %479 }
 0x1bb   :  { %v483_v26 = vmul.f32 %v480_v28, %v1056_v56  ;;  %v482_v27 = vmul.f32 %v480_v28, %v1072_v2  ;;  %v496_v32 = vmul.f32 %v480_v28, %v1065_v62  ;;  %v495_v33 = vmul.f32 %v480_v28, %v1083_v7 }
 0x1be   :  { %v450_v12 = vpop.permute.xlu1 %449 }
 0x1bf   :  { %v453_v11 = vmul.f32 %v450_v12, %v1056_v56  ;;  %v452_v14 = vmul.f32 %v450_v12, %v1072_v2  ;;  %v466_v15 = vmul.f32 %v450_v12, %v1065_v62  ;;  %v465_v16 = vmul.f32 %v450_v12, %v1083_v7  ;;  %v598_v45 = vpop.permute.xlu0 %597 }
 0x1c0   :  { %v600_v48 = vmul.f32 %v598_v45, %v1253_v22  ;;  %v601_v18 = vmul.f32 %v598_v45, %v1258_v47 }
 0x1c1   :  { %458 = vrot.lane.b32.xlu1 %v453_v11, %s929_s21  ;;  %456 = vrot.lane.b32.xlu0 %v452_v14, %s929_s21 }
 0x1c3   :  { %v510_v23 = vpop.permute.xlu1 %509 }
 0x1c4   :  { %v512_v35 = vmul.f32 %v510_v23, %v1072_v2  ;;  %v525_v37 = vmul.f32 %v510_v23, %v1083_v7  ;;  %v513_v38 = vmul.f32 %v510_v23, %v1056_v56  ;;  %v526_v43 = vmul.f32 %v510_v23, %v1065_v62  ;;  %v688_v57 = vpop.permute.xlu0 %687 }
 0x1c5   :  { %471 = vrot.lane.b32.xlu1 %v466_v15, %s929_s21  ;;  %469 = vrot.lane.b32.xlu0 %v465_v16, %s929_s21  ;;  %v690_v34 = vmul.f32 %v688_v57, %v1253_v22  ;;  %v691_v59 = vmul.f32 %v688_v57, %v1258_v47 }
 0x1c8   :  { %v540_v31 = vpop.permute.xlu1 %539 }
 0x1c9   :  { %488 = vrot.lane.b32.xlu1 %v483_v26, %s930_s22  ;;  %486 = vrot.lane.b32.xlu0 %v482_v27, %s930_s22  ;;  %v542_v40 = vmul.f32 %v540_v31, %v1072_v2  ;;  %v555_v44 = vmul.f32 %v540_v31, %v1083_v7  ;;  %v586_v2 = vsub.s32 5, %v987_v17  ;;  %v556_v21 = vmul.f32 %v540_v31, %v1065_v62 }
 0x1cb   :  { %v1267_v7 = vrot.slane %v998_v20, %v586_v2 }
 0x1cd   :  { %501 = vrot.lane.b32.xlu1 %v496_v32, %s930_s22  ;;  %499 = vrot.lane.b32.xlu0 %v495_v33, %s930_s22  ;;  %v628_v36 = vpop.permute.xlu1 %627  ;;  %v614_v62 = vmul.f32 %v598_v45, %v1267_v7  ;;  %v704_v61 = vmul.f32 %v688_v57, %v1267_v7 }
 0x1ce   :  { %v630_v50 = vmul.f32 %v628_v36, %v1253_v22  ;;  %v631_v51 = vmul.f32 %v628_v36, %v1258_v47  ;;  %v644_v53 = vmul.f32 %v628_v36, %v1267_v7 }
 0x1d1   :  { %569 = vperm.xlu1 %909, %v972_v3   ;;  %516 = vrot.lane.b32.xlu0 %v512_v35, %s931_s23  ;;  %v543_v3 = vmul.f32 %v540_v31, %v1056_v56  ;;  %v1262_v56 = vrot.slane %v993_v19, %v586_v2 }
 0x1d2   :  { %v658_v39 = vpop.permute.xlu1 %657 }
 0x1d3   :  { %v613_v49 = vmul.f32 %v598_v45, %v1262_v56  ;;  %v643_v29 = vmul.f32 %v628_v36, %v1262_v56  ;;  %v660_v25 = vmul.f32 %v658_v39, %v1253_v22  ;;  %v661_v55 = vmul.f32 %v658_v39, %v1258_v47 }
 0x1d4   :  { %v673_v30 = vmul.f32 %v658_v39, %v1262_v56  ;;  %v674_v58 = vmul.f32 %v658_v39, %v1267_v7  ;;  %v703_v60 = vmul.f32 %v688_v57, %v1262_v56 }
 0x1d5   :  { %518 = vrot.lane.b32.xlu0 %v513_v38, %s931_s23  ;;  %529 = vrot.lane.b32.xlu1 %v525_v37, %s931_s23 }
 0x1d7   :  { %v718_v13 = vpop.permute.xlu1 %717 }
 0x1d8   :  { %v720_v41 = vmul.f32 %v718_v13, %v1253_v22  ;;  %v733_v0 = vmul.f32 %v718_v13, %v1262_v56  ;;  %v734_v1 = vmul.f32 %v718_v13, %v1267_v7 }
 0x1d9   :  { %531 = vrot.lane.b32.xlu0 %v526_v43, %s931_s23  ;;  %546 = vrot.lane.b32.xlu1 %v542_v40, %s932_s24 }
 0x1dc   :  { %v748_v4 = vpop.permute.xlu1 %747 }
 0x1dd   :  { %548 = vrot.lane.b32.xlu0 %v543_v3, %s932_s24  ;;  %559 = vrot.lane.b32.xlu1 %v555_v44, %s932_s24  ;;  %v750_v5 = vmul.f32 %v748_v4, %v1253_v22  ;;  %v751_v6 = vmul.f32 %v748_v4, %v1258_v47  ;;  %v763_v8 = vmul.f32 %v748_v4, %v1262_v56 }
 0x1de   :  { %v764_v12 = vmul.f32 %v748_v4, %v1267_v7 }
 0x1e1   :  { %561 = vrot.lane.b32.xlu0 %v556_v21, %s932_s24  ;;  %v1270_v17 = vpop.permute.xlu1 %807  ;;  %604 = vrot.lane.b32.xlu1 %v600_v48, %s925_s2 }
 0x1e2   :  { %v810_v16 = vmul.f32 %v1270_v17, %v1253_v22  ;;  %v811_v23 = vmul.f32 %v1270_v17, %v1258_v47  ;;  %v823_v26 = vmul.f32 %v1270_v17, %v1262_v56  ;;  %v824_v27 = vmul.f32 %v1270_v17, %v1267_v7 }
 0x1e5   :  { %606 = vrot.lane.b32.xlu0 %v601_v18, %s925_s2  ;;  %v1276_v19 = vpop.permute.xlu1 %441  ;;  %617 = vrot.lane.b32.xlu1 %v613_v49, %s925_s2 }
 0x1e6   :  { %v443_v20 = vsel %vm157_vm3, %v440_v52, %v1276_v19  ;;  %v778_v52 = vpop.permute.xlu0 %777 }
 0x1e7   :  { %v1284_v46 = vadd.f32 %v443_v20, %v1211_v24  ;;  %v721_v24 = vmul.f32 %v718_v13, %v1258_v47  ;;  %v780_v11 = vmul.f32 %v778_v52, %v1253_v22  ;;  %v781_v14 = vmul.f32 %v778_v52, %v1258_v47 }
 0x1e8   :  { %v793_v28 = vmul.f32 %v778_v52, %v1262_v56  ;;  %v794_v15 = vmul.f32 %v778_v52, %v1267_v7 }
 0x1e9   :  { %619 = vrot.lane.b32.xlu0 %v614_v62, %s925_s2  ;;  %634 = vrot.lane.b32.xlu1 %v630_v50, %s926_s18 }
 0x1ed   :  { %636 = vrot.lane.b32.xlu0 %v631_v51, %s926_s18  ;;  %647 = vrot.lane.b32.xlu1 %v643_v29, %s926_s18 }
 0x1f1   :  { %649 = vrot.lane.b32.xlu0 %v644_v53, %s926_s18  ;;  %664 = vrot.lane.b32.xlu1 %v660_v25, %s927_s19 }
 0x1f5   :  { %666 = vrot.lane.b32.xlu0 %v661_v55, %s927_s19  ;;  %677 = vrot.lane.b32.xlu1 %v673_v30, %s927_s19 }
 0x1f9   :  { %679 = vrot.lane.b32.xlu0 %v674_v58, %s927_s19  ;;  %694 = vrot.lane.b32.xlu1 %v690_v34, %s928_s20 }
 0x1fd   :  { %696 = vrot.lane.b32.xlu0 %v691_v59, %s928_s20  ;;  %707 = vrot.lane.b32.xlu1 %v703_v60, %s928_s20 }
 0x201   :  { %709 = vrot.lane.b32.xlu0 %v704_v61, %s928_s20  ;;  %724 = vrot.lane.b32.xlu1 %v720_v41, %s929_s21 }
 0x205   :  { %726 = vrot.lane.b32.xlu0 %v721_v24, %s929_s21  ;;  %737 = vrot.lane.b32.xlu1 %v733_v0, %s929_s21  ;;  %v417_v24 = vadd.f32 %v1206_v63, %v1201_v54 }
 0x209   :  { %739 = vrot.lane.b32.xlu0 %v734_v1, %s929_s21  ;;  %754 = vrot.lane.b32.xlu1 %v750_v5, %s930_s22  ;;  %v447_v5 = vadd.f32 %v1276_v19, %v417_v24 }
 0x20d   :  { %756 = vrot.lane.b32.xlu0 %v751_v6, %s930_s22  ;;  %767 = vrot.lane.b32.xlu1 %v763_v8, %s930_s22 }
 0x211   :  { %769 = vrot.lane.b32.xlu0 %v764_v12, %s930_s22  ;;  %784 = vrot.lane.b32.xlu1 %v780_v11, %s931_s23 }
 0x215   :  { %786 = vrot.lane.b32.xlu0 %v781_v14, %s931_s23  ;;  %797 = vrot.lane.b32.xlu1 %v793_v28, %s931_s23 }
 0x219   :  { %799 = vrot.lane.b32.xlu0 %v794_v15, %s931_s23  ;;  %814 = vrot.lane.b32.xlu1 %v810_v16, %s932_s24 }
 0x21d   :  { %816 = vrot.lane.b32.xlu0 %v811_v23, %s932_s24  ;;  %827 = vrot.lane.b32.xlu1 %v823_v26, %s932_s24 }
 0x221   :  { %829 = vrot.lane.b32.xlu0 %v824_v27, %s932_s24 }
 0x233   :  { %v457_v31 = vpop.permute.xlu0 %456  ;;  %v459_v32 = vpop.permute.xlu1 %458 }
 0x234   :  { %v460_v33 = vsel %vm188_vm4, %v457_v31, %v459_v32  ;;  %v464_v0 = vadd.f32 %v459_v32, %v1218_v9 }
 0x235   :  { %v463_v35 = vadd.f32 %v460_v33, %v1220_v10 }
 0x237   :  { %v470_v36 = vpop.permute.xlu0 %469  ;;  %v472_v37 = vpop.permute.xlu1 %471 }
 0x238   :  { %v473_v38 = vsel %vm188_vm4, %v470_v36, %v472_v37  ;;  %v477_v52 = vadd.f32 %v472_v37, %v447_v5 }
 0x239   :  { %v476_v39 = vadd.f32 %v473_v38, %v1284_v46 }
 0x23b   :  { %v487_v40 = vpop.permute.xlu0 %486  ;;  %v489_v42 = vpop.permute.xlu1 %488 }
 0x23c   :  { %v490_v43 = vsel %vm219_vm5, %v487_v40, %v489_v42  ;;  %v494_v6 = vadd.f32 %v489_v42, %v464_v0 }
 0x23d   :  { %v493_v13 = vadd.f32 %v490_v43, %v463_v35 }
 0x23f   :  { %v500_v3 = vpop.permute.xlu0 %499  ;;  %v502_v44 = vpop.permute.xlu1 %501 }
 0x240   :  { %v503_v2 = vsel %vm219_vm5, %v500_v3, %v502_v44  ;;  %v507_v14 = vadd.f32 %v502_v44, %v477_v52 }
 0x241   :  { %v506_v45 = vadd.f32 %v503_v2, %v476_v39 }
 0x243   :  { %v517_v4 = vpop.permute.xlu0 %516 }
 0x247   :  { %v519_v21 = vpop.permute.xlu0 %518 }
 0x248   :  { %v524_v12 = vadd.f32 %v519_v21, %v494_v6  ;;  %v520_v16 = vsel %vm250_vm6, %v517_v4, %v519_v21 }
 0x249   :  { %v523_v9 = vadd.f32 %v520_v16, %v493_v13 }
 0x24b   :  { %v532_v48 = vpop.permute.xlu0 %531 }
 0x24c   :  { %v570_v10 = vpop.permute.xlu1 %569  ;;  %v537_v23 = vadd.f32 %v532_v48, %v507_v14 }
 0x24d   :  { %v581_v26 = vmul.f32 %v1258_v47, %v570_v10  ;;  %v593_v36 = vmul.f32 %v1267_v7, %v570_v10  ;;  %v580_v39 = vmul.f32 %v1253_v22, %v570_v10  ;;  %v592_v7 = vmul.f32 %v1262_v56, %v570_v10 }
 0x24f   :  { %v549_v17 = vpop.permute.xlu0 %548 }
 0x250   :  { %v530_v18 = vpop.permute.xlu1 %529  ;;  %v554_v28 = vadd.f32 %v549_v17, %v524_v12 }
 0x251   :  { %v533_v32 = vsel %vm250_vm6, %v530_v18, %v532_v48 }
 0x252   :  { %v583_v19 = vadd.f32 %v581_v26, %v554_v28  ;;  %v536_v40 = vadd.f32 %v533_v32, %v506_v45 }
 0x253   :  { %v562_v49 = vpop.permute.xlu0 %561 }
 0x254   :  { %v547_v62 = vpop.permute.xlu1 %546  ;;  %v567_v27 = vadd.f32 %v562_v49, %v537_v23 }
 0x255   :  { %v550_v54 = vsel %vm281_vm7, %v547_v62, %v549_v17 }
 0x256   :  { %v553_v33 = vadd.f32 %v550_v54, %v523_v9  ;;  %v595_v47 = vadd.f32 %v593_v36, %v567_v27 }
 0x257   :  { %v607_v50 = vpop.permute.xlu0 %606 }
 0x258   :  { %v560_v20 = vpop.permute.xlu1 %559  ;;  %v612_v35 = vadd.f32 %v607_v50, %v583_v19  ;;  %v582_v2 = vadd.f32 %v580_v39, %v553_v33 }
 0x259   :  { %v563_v37 = vsel %vm281_vm7, %v560_v20, %v562_v49 }
 0x25a   :  { %v566_v3 = vadd.f32 %v563_v37, %v536_v40 }
 0x25b   :  { %v620_v46 = vpop.permute.xlu0 %619 }
 0x25c   :  { %v605_v51 = vpop.permute.xlu1 %604  ;;  %v625_v44 = vadd.f32 %v620_v46, %v595_v47  ;;  %v594_v20 = vadd.f32 %v592_v7, %v566_v3 }
 0x25d   :  { %v608_v13 = vsel %vm64_vm0, %v605_v51, %v607_v50 }
 0x25e   :  { %v611_v17 = vadd.f32 %v608_v13, %v582_v2 }
 0x25f   :  { %v637_v29 = vpop.permute.xlu0 %636 }
 0x260   :  { %v618_v53 = vpop.permute.xlu1 %617  ;;  %v642_v42 = vadd.f32 %v637_v29, %v612_v35 }
 0x261   :  { %v621_v22 = vsel %vm64_vm0, %v618_v53, %v620_v46 }
 0x262   :  { %v624_v5 = vadd.f32 %v621_v22, %v594_v20 }
 0x263   :  { %v650_v25 = vpop.permute.xlu0 %649 }
 0x264   :  { %v635_v55 = vpop.permute.xlu1 %634  ;;  %v655_v18 = vadd.f32 %v650_v25, %v625_v44 }
 0x265   :  { %v638_v21 = vsel %vm95_vm1, %v635_v55, %v637_v29 }
 0x266   :  { %v641_v24 = vadd.f32 %v638_v21, %v611_v17 }
 0x267   :  { %v667_v30 = vpop.permute.xlu0 %666 }
 0x268   :  { %v648_v57 = vpop.permute.xlu1 %647  ;;  %v672_v4 = vadd.f32 %v667_v30, %v642_v42 }
 0x269   :  { %v651_v0 = vsel %vm95_vm1, %v648_v57, %v650_v25 }
 0x26b   :  { %v1352_v58 = vpop.permute.xlu0 %679 }
 0x26c   :  { %v665_v34 = vpop.permute.xlu1 %664  ;;  %v685_v50 = vadd.f32 %v1352_v58, %v655_v18 }
 0x26d   :  { %v668_v45 = vsel %vm126_vm2, %v665_v34, %v667_v30  ;;  %v654_v30 = vadd.f32 %v651_v0, %v624_v5 }
 0x26e   :  { %v671_v56 = vadd.f32 %v668_v45, %v641_v24 }
 0x26f   :  { %v697_v59 = vpop.permute.xlu0 %696 }
 0x270   :  { %v678_v60 = vpop.permute.xlu1 %677  ;;  %v702_v49 = vadd.f32 %v697_v59, %v672_v4 }
 0x271   :  { %v681_v46 = vsel %vm126_vm2, %v678_v60, %v1352_v58 }
 0x273   :  { %v1354_v61 = vpop.permute.xlu0 %709 }
 0x274   :  { %v695_v41 = vpop.permute.xlu1 %694  ;;  %v715_v10 = vadd.f32 %v1354_v61, %v685_v50 }
 0x275   :  { %v698_v29 = vsel %vm157_vm3, %v695_v41, %v697_v59  ;;  %v684_v41 = vadd.f32 %v681_v46, %v654_v30 }
 0x276   :  { %v701_v34 = vadd.f32 %v698_v29, %v671_v56 }
 0x277   :  { %v727_v1 = vpop.permute.xlu0 %726 }
 0x278   :  { %v708_v8 = vpop.permute.xlu1 %707  ;;  %v732_v51 = vadd.f32 %v727_v1, %v702_v49 }
 0x279   :  { %v711_v25 = vsel %vm157_vm3, %v708_v8, %v1354_v61 }
 0x27b   :  { %v1360_v11 = vpop.permute.xlu0 %739 }
 0x27c   :  { %v725_v15 = vpop.permute.xlu1 %724  ;;  %v745_v12 = vadd.f32 %v1360_v11, %v715_v10 }
 0x27d   :  { %v728_v53 = vsel %vm188_vm4, %v725_v15, %v727_v1  ;;  %v714_v1 = vadd.f32 %v711_v25, %v684_v41 }
 0x27e   :  { %v731_v28 = vadd.f32 %v728_v53, %v701_v34 }
 0x27f   :  { %v757_v63 = vpop.permute.xlu0 %756 }
 0x280   :  { %v738_v31 = vpop.permute.xlu1 %737  ;;  %v762_v6 = vadd.f32 %v757_v63, %v732_v51 }
 0x281   :  { %v741_v58 = vsel %vm188_vm4, %v738_v31, %v1360_v11 }
 0x283   :  { %v770_v38 = vpop.permute.xlu0 %769 }
 0x284   :  { %v755_v43 = vpop.permute.xlu1 %754  ;;  %v775_v16 = vadd.f32 %v770_v38, %v745_v12 }
 0x285   :  { %v758_v57 = vsel %vm219_vm5, %v755_v43, %v757_v63  ;;  %v744_v63 = vadd.f32 %v741_v58, %v714_v1 }
 0x286   :  { %v761_v15 = vadd.f32 %v758_v57, %v731_v28 }
 0x287   :  { %v787_v48 = vpop.permute.xlu0 %786 }
 0x288   :  { %v768_v62 = vpop.permute.xlu1 %767  ;;  %v792_v14 = vadd.f32 %v787_v48, %v762_v6 }
 0x289   :  { %v771_v61 = vsel %vm219_vm5, %v768_v62, %v770_v38 }
 0x28a   :  { %v774_v31 = vadd.f32 %v771_v61, %v744_v63 }
 0x28b   :  { %v800_v55 = vpop.permute.xlu0 %799 }
 0x28c   :  { %v785_v52 = vpop.permute.xlu1 %784  ;;  %v805_v54 = vadd.f32 %v800_v55, %v775_v16 }
 0x28d   :  { %v788_v60 = vsel %vm250_vm6, %v785_v52, %v787_v48 }
 0x28e   :  { %v791_v9 = vadd.f32 %v788_v60, %v761_v15 }
 0x28f   :  { %v817_v59 = vpop.permute.xlu0 %816 }
 0x290   :  { %v822_v23 = vadd.f32 %v817_v59, %v792_v14  ;;  %v798_v26 = vpop.permute.xlu1 %797 }
 0x291   :  { %v801_v32 = vsel %vm250_vm6, %v798_v26, %v800_v55 }
 0x292   :  { %838 = vst.msk [vmem:[%s1409_s3 + $0x8] sm:$0x3f] %vm837_vm8, %v822_v23  ;;  %v804_v35 = vadd.f32 %v801_v32, %v774_v31 }
 0x293   :  { %v830_v8 = vpop.permute.xlu0 %829 }
 0x294   :  { %v835_v27 = vadd.f32 %v830_v8, %v805_v54  ;;  %v815_v19 = vpop.permute.xlu1 %814 }
 0x295   :  { %v818_v11 = vsel %vm281_vm7, %v815_v19, %v817_v59 }
 0x296   :  { %847 = vst.msk [vmem:[%s1409_s3 + $0x18] sm:$0x3f] %vm837_vm8, %v835_v27  ;;  %v821_v33 = vadd.f32 %v818_v11, %v791_v9 }
 0x298   :  { %836 = vst [vmem:[%s1409_s3] sm:$0x3f] %v821_v33  ;;  %v828_v36 = vpop.permute.xlu1 %827 }
 0x299   :  { %v831_v37 = vsel %vm281_vm7, %v828_v36, %v830_v8 }
 0x29a   :  { %v834_v38 = vadd.f32 %v831_v37, %v804_v35 }
 0x29c   :  { %846 = vst [vmem:[%s1409_s3 + $0x10] sm:$0x3f] %v834_v38 }

</bundles_post_ra>
